<compile_context>
chip_gen: v5e
topology: v5e:2x2
jax: 0.10.0
libtpu: 0.0.40
codegen_flags: <defaults>
</compile_context>

<pallas_src>
import jax
import jax.numpy as jnp
from jax.experimental import pallas as pl
from jax.experimental.pallas import tpu as pltpu


def _attention_kernel(enc_ref, dec_ref,
                      we_ref, be_ref,
                      wd_ref, bd_ref,
                      wf_ref, bf_ref,
                      ctx_ref, alpha_ref):
    # enc_ref : (Bt, N, E) compute dtype      dec_ref : (Bt, D) compute dtype
    # we_ref  : (E, A)     compute dtype      wd_ref  : (D, A)  compute dtype
    # be_ref/bd_ref : (1, A) f32   wf_ref : (1, A) f32   bf_ref : (1, 1) f32
    # ctx_ref : (Bt, E) f32        alpha_ref : (Bt, N) f32 (lane-dense)
    bt, n, e_dim = enc_ref.shape
    a_dim = we_ref.shape[1]

    enc = enc_ref[...]                                        # (Bt, N, E)

    # encoder_att: fold batch into the matmul M dimension -> (Bt*N, E) @ (E, A)
    enc2d = enc.reshape(bt * n, e_dim)
    att1 = jnp.dot(enc2d, we_ref[...],
                   preferred_element_type=jnp.float32) + be_ref[...]   # (Bt*N, A)
    att1 = att1.reshape(bt, n, a_dim)

    # decoder_att: all Bt rows in one matmul -> (Bt, D) @ (D, A)
    att2 = jnp.dot(dec_ref[...], wd_ref[...],
                   preferred_element_type=jnp.float32) + bd_ref[...]   # (Bt, A)

    # ReLU(att1 + att2) on the VPU, f32
    h = jnp.maximum(att1 + att2[:, None, :], 0.0)             # (Bt, N, A)

    # full_att scoring: VPU multiply by the weight row + lane reduce over A.
    # Scores land as (Bt, N) with N on the lane axis (no lane-width-1 matmul).
    scores = jnp.sum(h * wf_ref[...][None, :, :], axis=-1) + bf_ref[...]  # (Bt, N)

    # softmax over the pixel axis N (lane reduce)
    m = jnp.max(scores, axis=-1, keepdims=True)               # (Bt, 1)
    e = jnp.exp(scores - m)
    s = jnp.sum(e, axis=-1, keepdims=True)                    # (Bt, 1)
    alpha = e * pl.reciprocal(s, approx=True)                 # (Bt, N) f32

    # context = sum_n alpha[b, n] * enc[b, n, :]  -> (Bt, E)
    ctx = jnp.sum(enc.astype(jnp.float32) * alpha[:, :, None], axis=1)

    ctx_ref[...] = ctx.astype(ctx_ref.dtype)
    alpha_ref[...] = alpha.astype(alpha_ref.dtype)            # lane-dense store


def attention_forward(encoder_out, decoder_hidden, params, *,
                      compute_dtype=jnp.bfloat16, block_b=8):
    """encoder_out: (B, N, E), decoder_hidden: (B, D).

    Returns (context (B, E) f32, alpha (B, N) f32) — same semantics as the
    PyTorch Attention module.
    """
    B, N, E = encoder_out.shape
    D = decoder_hidden.shape[1]
    A = params["w_enc"].shape[1]

    # Whole batch in one grid step when it fits; otherwise blocks of `block_b`
    # rows (a multiple of 8, so the sublane constraint on the 2-D outputs holds).
    # Padded rows of a partial trailing block are computed on garbage and the
    # corresponding output rows are discarded, which is safe because every
    # batch row is independent.
    bt = B if B <= block_b else block_b
    grid_b = pl.cdiv(B, bt)

    cd = compute_dtype
    enc = encoder_out.astype(cd)
    dec = decoder_hidden.astype(cd)
    w_enc = params["w_enc"].astype(cd)                         # (E, A)
    w_dec = params["w_dec"].astype(cd)                         # (D, A)
    b_enc = params["b_enc"].reshape(1, A).astype(jnp.float32)
    b_dec = params["b_dec"].reshape(1, A).astype(jnp.float32)
    w_full = params["w_full"].reshape(1, A).astype(jnp.float32)  # row layout, used on VPU
    b_full = params["b_full"].reshape(1, 1).astype(jnp.float32)

    # Note: for realistic dims (N~196, E~2048, A~512) on v7x, additionally size
    # bt against the 64 MiB VMEM and set vmem_limit_bytes; the weight BlockSpecs
    # below are grid-invariant (index_map constant), so they are fetched once.
    context, alpha = pl.pallas_call(
        _attention_kernel,
        out_shape=(
            jax.ShapeDtypeStruct((B, E), jnp.float32),         # context
            jax.ShapeDtypeStruct((B, N), jnp.float32),         # alpha (lane-dense)
        ),
        grid_spec=pltpu.PrefetchScalarGridSpec(
            num_scalar_prefetch=0,
            grid=(grid_b,),
            in_specs=[
                pl.BlockSpec((bt, N, E), lambda b: (b, 0, 0)),  # encoder_out
                pl.BlockSpec((bt, D), lambda b: (b, 0)),        # decoder_hidden
                pl.BlockSpec((E, A), lambda b: (0, 0)),         # w_enc
                pl.BlockSpec((1, A), lambda b: (0, 0)),         # b_enc
                pl.BlockSpec((D, A), lambda b: (0, 0)),         # w_dec
                pl.BlockSpec((1, A), lambda b: (0, 0)),         # b_dec
                pl.BlockSpec((1, A), lambda b: (0, 0)),         # w_full (row)
                pl.BlockSpec((1, 1), lambda b: (0, 0)),         # b_full
            ],
            out_specs=[
                pl.BlockSpec((bt, E), lambda b: (b, 0)),        # context
                pl.BlockSpec((bt, N), lambda b: (b, 0)),        # alpha
            ],
        ),
        compiler_params=pltpu.CompilerParams(
            dimension_semantics=("parallel",)),                 # shards batch blocks on v7x's 2 TCs
    )(enc, dec, w_enc, b_enc, w_dec, b_dec, w_full, b_full)

    return context, alpha


def _reference_forward(encoder_out, decoder_hidden, params):
    att1 = encoder_out @ params["w_enc"] + params["b_enc"]
    att2 = decoder_hidden @ params["w_dec"] + params["b_dec"]
    h = jnp.maximum(att1 + att2[:, None, :], 0.0)
    att = (h @ params["w_full"] + params["b_full"])[:, :, 0]
    alpha = jax.nn.softmax(att, axis=1)
    context = (encoder_out * alpha[:, :, None]).sum(axis=1)
    return context, alpha


def _init_params(key, encoder_dim, decoder_dim, attention_dim):
    k = jax.random.split(key, 6)
    scale = 0.05
    return {
        "w_enc": scale * jax.random.normal(k[0], (encoder_dim, attention_dim), jnp.float32),
        "b_enc": scale * jax.random.normal(k[1], (attention_dim,), jnp.float32),
        "w_dec": scale * jax.random.normal(k[2], (decoder_dim, attention_dim), jnp.float32),
        "b_dec": scale * jax.random.normal(k[3], (attention_dim,), jnp.float32),
        "w_full": scale * jax.random.normal(k[4], (attention_dim, 1), jnp.float32),
        "b_full": scale * jax.random.normal(k[5], (1,), jnp.float32),
    }


if __name__ == "__main__":
    # batch, num_pixels, encoder_dim, decoder_dim, attention_dim
    B, N, E, D, A = 2, 8, 32, 64, 32

    key = jax.random.PRNGKey(0)
    k_enc, k_dec, k_par = jax.random.split(key, 3)
    encoder_out = jax.random.normal(k_enc, (B, N, E), jnp.float32)
    decoder_hidden = jax.random.normal(k_dec, (B, D), jnp.float32)
    params = _init_params(k_par, E, D, A)

    ref_ctx, ref_alpha = _reference_forward(encoder_out, decoder_hidden, params)

    # f32 path (tight check; approx reciprocal only deviation)
    ctx32, al32 = attention_forward(encoder_out, decoder_hidden, params,
                                    compute_dtype=jnp.float32)
    ctx32 = jax.block_until_ready(ctx32)
    al32 = jax.block_until_ready(al32)
    assert ctx32.shape == (B, E) and al32.shape == (B, N)
    assert jnp.allclose(ctx32, ref_ctx, atol=5e-3, rtol=5e-3)
    assert jnp.allclose(al32, ref_alpha, atol=5e-3, rtol=5e-3)

    # bf16 path (MXU-friendly; f32 accumulation keeps it within loose tolerance)
    ctx_bf, al_bf = attention_forward(encoder_out, decoder_hidden, params,
                                      compute_dtype=jnp.bfloat16)
    ctx_bf = jax.block_until_ready(ctx_bf)
    al_bf = jax.block_until_ready(al_bf)
    assert ctx_bf.shape == (B, E) and al_bf.shape == (B, N)
    assert jnp.allclose(ctx_bf, ref_ctx, atol=3e-2, rtol=3e-2)
    assert jnp.allclose(al_bf, ref_alpha, atol=3e-2, rtol=3e-2)

    print("KERNEL_OK")
</pallas_src>

<mosaic_0001>
module attributes {stable_mosaic.version = 11 : i64} {
  func.func @_attention_kernel(%arg0: i32, %arg1: memref<2x8x32xf32, #tpu.memory_space<vmem>>, %arg2: memref<2x64xf32, #tpu.memory_space<vmem>>, %arg3: memref<32x32xf32, #tpu.memory_space<vmem>>, %arg4: memref<1x32xf32, #tpu.memory_space<vmem>>, %arg5: memref<64x32xf32, #tpu.memory_space<vmem>>, %arg6: memref<1x32xf32, #tpu.memory_space<vmem>>, %arg7: memref<1x32xf32, #tpu.memory_space<vmem>>, %arg8: memref<1x1xf32, #tpu.memory_space<vmem>>, %arg9: memref<2x32xf32, #tpu.memory_space<vmem>>, %arg10: memref<2x8xf32, #tpu.memory_space<vmem>>) attributes {dimension_semantics = [#tpu.dimension_semantics<parallel>], iteration_bounds = array<i64: 1>, scalar_prefetch = 0 : i64, scratch_operands = 0 : i64, tpu.core_type = #tpu.core_type<tc>, window_params = [{transform_indices = @transform_0, window_bounds = array<i64: 2, 8, 32>}, {transform_indices = @transform_1, window_bounds = array<i64: 2, 64>}, {pipeline_mode = #tpu.pipeline_mode<synchronous>, transform_indices = @transform_2, window_bounds = array<i64: 32, 32>}, {pipeline_mode = #tpu.pipeline_mode<synchronous>, transform_indices = @transform_3, window_bounds = array<i64: 1, 32>}, {pipeline_mode = #tpu.pipeline_mode<synchronous>, transform_indices = @transform_4, window_bounds = array<i64: 64, 32>}, {pipeline_mode = #tpu.pipeline_mode<synchronous>, transform_indices = @transform_5, window_bounds = array<i64: 1, 32>}, {pipeline_mode = #tpu.pipeline_mode<synchronous>, transform_indices = @transform_6, window_bounds = array<i64: 1, 32>}, {pipeline_mode = #tpu.pipeline_mode<synchronous>, transform_indices = @transform_7, window_bounds = array<i64: 1, 1>}, {transform_indices = @transform_8, window_bounds = array<i64: 2, 32>}, {transform_indices = @transform_9, window_bounds = array<i64: 2, 8>}]} {
    %c0 = arith.constant 0 : index
    %c0_0 = arith.constant 0 : index
    %c0_1 = arith.constant 0 : index
    %0 = vector.load %arg1[%c0, %c0_0, %c0_1] : memref<2x8x32xf32, #tpu.memory_space<vmem>>, vector<2x8x32xf32>
    %1 = vector.shape_cast %0 : vector<2x8x32xf32> to vector<16x32xf32>
    %c0_2 = arith.constant 0 : index
    %c0_3 = arith.constant 0 : index
    %2 = vector.load %arg3[%c0_2, %c0_3] : memref<32x32xf32, #tpu.memory_space<vmem>>, vector<32x32xf32>
    %cst = arith.constant dense<0.000000e+00> : vector<16x32xf32>
    %3 = tpu.matmul %1, %2, %cst {dimension_numbers = #tpu.dot_dimension_numbers<[1], [0], [0], [1], [0, 0, 1, 1], [], []>} : vector<16x32xf32>, vector<32x32xf32>, vector<16x32xf32> -> vector<16x32xf32>
    %c0_4 = arith.constant 0 : index
    %c0_5 = arith.constant 0 : index
    %4 = vector.load %arg4[%c0_4, %c0_5] : memref<1x32xf32, #tpu.memory_space<vmem>>, vector<1x32xf32>
    %5 = vector.broadcast %4 : vector<1x32xf32> to vector<16x32xf32>
    %6 = arith.addf %3, %5 : vector<16x32xf32>
    %7 = vector.shape_cast %6 : vector<16x32xf32> to vector<2x8x32xf32>
    %c0_6 = arith.constant 0 : index
    %c0_7 = arith.constant 0 : index
    %8 = vector.load %arg2[%c0_6, %c0_7] : memref<2x64xf32, #tpu.memory_space<vmem>>, vector<2x64xf32>
    %c0_8 = arith.constant 0 : index
    %c0_9 = arith.constant 0 : index
    %9 = vector.load %arg5[%c0_8, %c0_9] : memref<64x32xf32, #tpu.memory_space<vmem>>, vector<64x32xf32>
    %cst_10 = arith.constant dense<0.000000e+00> : vector<2x32xf32>
    %10 = tpu.matmul %8, %9, %cst_10 {dimension_numbers = #tpu.dot_dimension_numbers<[1], [0], [0], [1], [0, 0, 1, 1], [], []>} : vector<2x64xf32>, vector<64x32xf32>, vector<2x32xf32> -> vector<2x32xf32>
    %c0_11 = arith.constant 0 : index
    %c0_12 = arith.constant 0 : index
    %11 = vector.load %arg6[%c0_11, %c0_12] : memref<1x32xf32, #tpu.memory_space<vmem>>, vector<1x32xf32>
    %12 = vector.broadcast %11 : vector<1x32xf32> to vector<2x32xf32>
    %13 = arith.addf %10, %12 : vector<2x32xf32>
    %14 = vector.shape_cast %13 : vector<2x32xf32> to vector<2x1x32xf32>
    %15 = vector.broadcast %14 : vector<2x1x32xf32> to vector<2x8x32xf32>
    %16 = arith.addf %7, %15 : vector<2x8x32xf32>
    %cst_13 = arith.constant 0.000000e+00 : f32
    %17 = vector.broadcast %cst_13 : f32 to vector<2x8x32xf32>
    %18 = arith.maximumf %16, %17 : vector<2x8x32xf32>
    %c0_14 = arith.constant 0 : index
    %c0_15 = arith.constant 0 : index
    %19 = vector.load %arg7[%c0_14, %c0_15] : memref<1x32xf32, #tpu.memory_space<vmem>>, vector<1x32xf32>
    %20 = vector.shape_cast %19 : vector<1x32xf32> to vector<1x1x32xf32>
    %21 = vector.broadcast %20 : vector<1x1x32xf32> to vector<2x8x32xf32>
    %22 = arith.mulf %18, %21 : vector<2x8x32xf32>
    %cst_16 = arith.constant dense<0.000000e+00> : vector<2x8xf32>
    %23 = vector.multi_reduction <add>, %22, %cst_16 [2] : vector<2x8x32xf32> to vector<2x8xf32>
    %c0_17 = arith.constant 0 : index
    %c0_18 = arith.constant 0 : index
    %24 = vector.load %arg8[%c0_17, %c0_18] : memref<1x1xf32, #tpu.memory_space<vmem>>, vector<1x1xf32>
    %25 = vector.broadcast %24 : vector<1x1xf32> to vector<2x8xf32>
    %26 = arith.addf %23, %25 : vector<2x8xf32>
    %cst_19 = arith.constant dense<0xFF800000> : vector<2xf32>
    %27 = vector.multi_reduction <maximumf>, %26, %cst_19 [1] : vector<2x8xf32> to vector<2xf32>
    %28 = vector.shape_cast %27 : vector<2xf32> to vector<2x1xf32>
    %29 = vector.broadcast %28 : vector<2x1xf32> to vector<2x8xf32>
    %30 = arith.subf %26, %29 : vector<2x8xf32>
    %31 = math.exp %30 : vector<2x8xf32>
    %cst_20 = arith.constant dense<0.000000e+00> : vector<2xf32>
    %32 = vector.multi_reduction <add>, %31, %cst_20 [1] : vector<2x8xf32> to vector<2xf32>
    %33 = vector.shape_cast %32 : vector<2xf32> to vector<2x1xf32>
    %34 = tpu.reciprocal %33 {approx = true} : vector<2x1xf32> -> vector<2x1xf32>
    %35 = vector.broadcast %34 : vector<2x1xf32> to vector<2x8xf32>
    %36 = arith.mulf %31, %35 : vector<2x8xf32>
    %37 = vector.shape_cast %36 : vector<2x8xf32> to vector<2x8x1xf32>
    %38 = vector.broadcast %37 : vector<2x8x1xf32> to vector<2x8x32xf32>
    %39 = arith.mulf %0, %38 : vector<2x8x32xf32>
    %cst_21 = arith.constant dense<0.000000e+00> : vector<2x32xf32>
    %40 = vector.multi_reduction <add>, %39, %cst_21 [1] : vector<2x8x32xf32> to vector<2x32xf32>
    %c0_22 = arith.constant 0 : index
    %c0_23 = arith.constant 0 : index
    %41 = vector.load %arg9[%c0_22, %c0_23] : memref<2x32xf32, #tpu.memory_space<vmem>>, vector<2x32xf32>
    tpu.vector_store %arg9[%c0_22, %c0_23], %40 {strides = array<i32>} : memref<2x32xf32, #tpu.memory_space<vmem>>, vector<2x32xf32>,
    %c0_24 = arith.constant 0 : index
    %c0_25 = arith.constant 0 : index
    %42 = vector.load %arg10[%c0_24, %c0_25] : memref<2x8xf32, #tpu.memory_space<vmem>>, vector<2x8xf32>
    tpu.vector_store %arg10[%c0_24, %c0_25], %36 {strides = array<i32>} : memref<2x8xf32, #tpu.memory_space<vmem>>, vector<2x8xf32>,
    return
  }
  func.func @transform_0(%arg0: i32) -> (i32, i32, i32) {
    %c0_i32 = arith.constant 0 : i32
    %c0_i32_0 = arith.constant 0 : i32
    %c0_i32_1 = arith.constant 0 : i32
    return %arg0, %c0_i32, %c0_i32_0 : i32, i32, i32
  }
  func.func @transform_1(%arg0: i32) -> (i32, i32) {
    %c0_i32 = arith.constant 0 : i32
    %c0_i32_0 = arith.constant 0 : i32
    return %arg0, %c0_i32 : i32, i32
  }
  func.func @transform_2(%arg0: i32) -> (i32, i32) {
    %c0_i32 = arith.constant 0 : i32
    %c0_i32_0 = arith.constant 0 : i32
    %c0_i32_1 = arith.constant 0 : i32
    return %c0_i32, %c0_i32_0 : i32, i32
  }
  func.func @transform_3(%arg0: i32) -> (i32, i32) {
    %c0_i32 = arith.constant 0 : i32
    %c0_i32_0 = arith.constant 0 : i32
    %c0_i32_1 = arith.constant 0 : i32
    return %c0_i32, %c0_i32_0 : i32, i32
  }
  func.func @transform_4(%arg0: i32) -> (i32, i32) {
    %c0_i32 = arith.constant 0 : i32
    %c0_i32_0 = arith.constant 0 : i32
    %c0_i32_1 = arith.constant 0 : i32
    return %c0_i32, %c0_i32_0 : i32, i32
  }
  func.func @transform_5(%arg0: i32) -> (i32, i32) {
    %c0_i32 = arith.constant 0 : i32
    %c0_i32_0 = arith.constant 0 : i32
    %c0_i32_1 = arith.constant 0 : i32
    return %c0_i32, %c0_i32_0 : i32, i32
  }
  func.func @transform_6(%arg0: i32) -> (i32, i32) {
    %c0_i32 = arith.constant 0 : i32
    %c0_i32_0 = arith.constant 0 : i32
    %c0_i32_1 = arith.constant 0 : i32
    return %c0_i32, %c0_i32_0 : i32, i32
  }
  func.func @transform_7(%arg0: i32) -> (i32, i32) {
    %c0_i32 = arith.constant 0 : i32
    %c0_i32_0 = arith.constant 0 : i32
    %c0_i32_1 = arith.constant 0 : i32
    return %c0_i32, %c0_i32_0 : i32, i32
  }
  func.func @transform_8(%arg0: i32) -> (i32, i32) {
    %c0_i32 = arith.constant 0 : i32
    %c0_i32_0 = arith.constant 0 : i32
    return %arg0, %c0_i32 : i32, i32
  }
  func.func @transform_9(%arg0: i32) -> (i32, i32) {
    %c0_i32 = arith.constant 0 : i32
    %c0_i32_0 = arith.constant 0 : i32
    return %arg0, %c0_i32 : i32, i32
  }
}

</mosaic_0001>

<bundles_post_ra>
// kernel: tpu_custom_call.1
= control target key start
LH: loop header
LB: loop body
LE: loop exit
PB: predicated region body
PF: predicated region fallthrough
CT: control target
= control target key end

     0   :  { %s471_s0 = inlined_call_operand.vmem [shape: f32[2,8,32], index: 0, kind: input, shape index: {}]   ;;  %s472_s1 = inlined_call_operand.vmem [shape: f32[2,64], index: 1, kind: input, shape index: {}]   ;;  %s473_s2 = inlined_call_operand.vmem [shape: f32[32,32], index: 2, kind: input, shape index: {}]   ;;  %s474_s3 = inlined_call_operand.vmem [shape: f32[1,32], index: 3, kind: input, shape index: {}]   ;;  %s475_s4 = inlined_call_operand.vmem [shape: f32[64,32], index: 4, kind: input, shape index: {}]   ;;  %s476_s5 = inlined_call_operand.vmem [shape: f32[1,32], index: 5, kind: input, shape index: {}]   ;;  %s477_s6 = inlined_call_operand.vmem [shape: f32[1,32], index: 6, kind: input, shape index: {}]   ;;  %s478_s7 = inlined_call_operand.<no memory space> [shape: f32[1,1], index: 7, kind: input, shape index: {}]   ;;  %s479_s8 = inlined_call_operand.hbm [shape: f32[2,32], index: 8, kind: output, shape index: {0}]   ;;  %s480_s9 = inlined_call_operand.hbm [shape: f32[2,8], index: 9, kind: output, shape index: {1}]  }
   0x1   :  { %v15_v0 = vstv %s478_s7 }
   0x2   :  { %16 = vst [vmem:[#allocation2] sm:$0x1] %v15_v0 }
   0x3   :  { %17 = vsyncpa [#allocation4], 0  ;;  %v83_v1 = vld [vmem:[%s475_s4 + $0x38] sm:$0xff]  ;;  %v82_v2 = vld [vmem:[%s475_s4 + $0x30] sm:$0xff]  ;;  %vm45_vm0 = vcmask 261120  }
   0x4   :  { %100 = vmatpush.msra.mxu1 %v83_v1  ;;  %v40_v3 = vld [vmem:[%s473_s2 + $0x18] sm:$0xff]  ;;  %v39_v4 = vld [vmem:[%s473_s2 + $0x10] sm:$0xff]  ;;  %v81_v5 = vld [vmem:[%s475_s4 + $0x28] sm:$0xff] }
   0x5   :  { %262 = vmatpush.msra.mxu2 %v40_v3  ;;  %64 = vmatpush.msra.mxu0 %v40_v3  ;;  %v38_v6 = vld [vmem:[%s473_s2 + $0x8] sm:$0xff]  ;;  %v80_v7 = vld [vmem:[%s475_s4 + $0x20] sm:$0xff]  ;;  %v79_v8 = vld [vmem:[%s475_s4 + $0x18] sm:$0xff] }
   0x6   :  { %101 = vmatpush.msra.mxu1 %v82_v2  ;;  %v37_v9 = vld [vmem:[%s473_s2] sm:$0xff]  ;;  %v420_v10 = vld [vmem:[%s471_s0 + $0x8] sm:$0xff] }
   0x7   :  { %263 = vmatpush.msra.mxu2 %v39_v4  ;;  %65 = vmatpush.msra.mxu0 %v39_v4 }
   0x8   :  { %102 = vmatpush.msra.mxu1 %v81_v5 }
   0x9   :  { %264 = vmatpush.msra.mxu2 %v38_v6  ;;  %66 = vmatpush.msra.mxu0 %v38_v6 }
   0xa   :  { %18 = vsyncpa [#allocation6], 0  ;;  %103 = vmatpush.msra.mxu1 %v80_v7  ;;  %v425_v11 = vld [vmem:[%s471_s0] sm:$0xff]  ;;  %v78_v12 = vld [vmem:[%s475_s4 + $0x10] sm:$0xff]  ;;  %vm88_vm1 = vcmask 523264   ;;  %v334_v16 = vmov 0   ;;  %v145_v39 = vlaneseq }
   0xb   :  { %265 = vmatpush.msra.mxu2 %v37_v9  ;;  %67 = vmatpush.msra.mxu0 %v37_v9  ;;  %v77_v13 = vld [vmem:[%s475_s4 + $0x8] sm:$0xff]  ;;  %v76_v14 = vld [vmem:[%s475_s4] sm:$0xff]  ;;  %vm149_vm2 = vcmask 1041409   ;;  %vm152_vm3 = vcmask 58368   ;;  %s245_s21 = sshll.u32 %s480_s9, 4  ;;  %s336_s9 = smov [#allocation3]   ;;  %s246_s21 = int_to_ptr.hbm [resolvable:$true] %s245_s21 }
   0xc   :  { %104 = vmatpush.msra.mxu1 %v79_v8  ;;  %260 = vmatmul.msk.f32.vlgmr.msra.gmra.mxu2 %vm45_vm0, %v420_v10  ;;  %v75_v15 = vld [vmem:[%s472_s1] sm:$0x3]  ;;  %v146_v41 = vand.u32 127, %v145_v39  ;;  %s232_s22 = sshll.u32 %s336_s9, 4  ;;  %s234_s25 = sshll.u32 %s479_s8, 4  ;;  %vm220_vm4 = vcmask 254976   ;;  %s233_s22 = int_to_ptr.vmem [resolvable:$true] %s232_s22  ;;  %s235_s25 = int_to_ptr.hbm [resolvable:$true] %s234_s25 }
   0xd   :  { %259 = vmatmul.msk.f32.vlgmr.msra.gmra.mxu0 %vm45_vm0, %v425_v11  ;;  %269 = vset.pattern.permute.xlu1 %v334_v16  ;;  %v275_v17 = vld [vmem:[#allocation2] ss:$0 sm:$0xff] }
   0xe   :  { %105 = vmatpush.msra.mxu1 %v78_v12  ;;  %270 = vset.pattern.permute.xlu2 %v334_v16  ;;  %v272_v18 = vld [vmem:[%s476_s5] ss:$0 sm:$0xff] }
   0xf   :  { %271 = vset.pattern.permute.xlu0 %v334_v16  ;;  %138 = vperm.xlu1 %269, %v275_v17   ;;  %v273_v19 = vld [vmem:[%s474_s3] ss:$0 sm:$0xff]  ;;  %s335_s3 = smov [#allocation5]  }
  0x10   :  { %106 = vmatpush.msra.mxu1 %v77_v13  ;;  %v274_v30 = vld [vmem:[%s477_s6] ss:$0 sm:$0xff]  ;;  %s243_s5 = sshll.u32 %s335_s3, 4  ;;  %s244_s5 = int_to_ptr.vmem [resolvable:$true] %s243_s5 }
  0x12   :  { %107 = vmatpush.msra.mxu1 %v76_v14 }
  0x13   :  { %261 = vmatmul.msk.f32.vlgmr.msra.gmra.mxu1 %vm88_vm1, %v75_v15 }
  0x81   :  { %v139_v40 = vpop.permute.xlu1 %138 }
  0x8a   :  { %v69_v20 = vpop.f32.mrf.mxu0 }
  0x8b   :  { %v70_v24 = vadd.f32 %v273_v19, %v69_v20 }
  0x8f   :  { %v72_v22 = vpop.f32.mrf.mxu2 }
  0x90   :  { %v109_v21 = vpop.f32.mrf.mxu1  ;;  %v73_v27 = vadd.f32 %v273_v19, %v72_v22 }
  0x91   :  { %v110_v23 = vadd.f32 %v272_v18, %v109_v21 }
  0x93   :  { %v113_v25 = vrot.slane %v110_v23, 1  ;;  %v114_v26 = vperm.slane %v110_v23, 0 }
  0x95   :  { %v115_v28 = vperm.slane %v113_v25, 0  ;;  %v118_v29 = vadd.f32 %v114_v26, %v70_v24 }
  0x97   :  { %v120_v31 = vmax.f32 %v118_v29, 0.0  ;;  %v119_v32 = vadd.f32 %v115_v28, %v73_v27 }
  0x99   :  { %v126_v33 = vmul.f32 %v274_v30, %v120_v31  ;;  %v121_v34 = vmax.f32 %v119_v32, 0.0 }
  0x9b   :  { %v128_v35 = vsel %vm45_vm0, %v126_v33, 0.0  ;;  %v127_v36 = vmul.f32 %v274_v30, %v121_v34 }
  0x9c   :  { %129 = vadd.xlane.f32.xlu0 %v128_v35 }
  0x9d   :  { %v131_v37 = vsel %vm45_vm0, %v127_v36, 0.0 }
  0xa4   :  { %132 = vadd.xlane.f32.xlu0 %v131_v37 }
 0x10f   :  { %v130_v38 = vpop.xlane.xlu0 %129 }
 0x110   :  { %v141_v42 = vadd.f32 %v139_v40, %v130_v38 }
 0x112   :  { %v147_v45 = vperm.slane %v141_v42, %v146_v41 }
 0x117   :  { %v133_v43 = vpop.xlane.xlu0 %132 }
 0x118   :  { %v142_v44 = vadd.f32 %v139_v40, %v133_v43 }
 0x11a   :  { %v148_v46 = vperm.slane %v142_v44, %v146_v41 }
 0x11c   :  { %v150_v47 = vsel %vm149_vm2, %v148_v46, %v147_v45 }
 0x11d   :  { %v153_v48 = vsel %vm152_vm3, %v150_v47, -inf }
 0x11e   :  { %154 = vmax.xlane.f32.xlu1 %v153_v48 }
 0x191   :  { %v155_v49 = vpop.xlane.xlu1 %154 }
 0x192   :  { %v157_v50 = vperm.slane %v155_v49, 0  ;;  %v158_v51 = vperm.slane %v155_v49, 1 }
 0x194   :  { %v161_v52 = vsub.f32 %v141_v42, %v157_v50  ;;  %v162_v54 = vsub.f32 %v142_v44, %v158_v51 }
 0x196   :  { %v163_v53 = vmul.f32 1.442695, %v161_v52  ;;  %v165_v55 = vmul.f32 1.442695, %v162_v54 }
 0x198   :  { %276 = vpow2.f32 %v163_v53 }
 0x199   :  { %278 = vpow2.f32 %v165_v55 }
 0x19e   :  { %v277_v56 = vpop.eup %276 }
 0x19f   :  { %170 = vperm.xlu2 %270, %v277_v56   ;;  %v279_v57 = vpop.eup %278 }
 0x1a7   :  { %173 = vperm.xlu2 %270, %v279_v57  }
 0x1f9   :  { %v171_v58 = vpop.permute.xlu2 %170 }
 0x1fa   :  { %v175_v60 = vperm.slane %v171_v58, %v146_v41 }
 0x201   :  { %v174_v59 = vpop.permute.xlu2 %173 }
 0x202   :  { %v176_v61 = vperm.slane %v174_v59, %v146_v41 }
 0x204   :  { %v177_v62 = vsel %vm149_vm2, %v176_v61, %v175_v60 }
 0x205   :  { %v179_v63 = vsel %vm152_vm3, %v177_v62, 0.0 }
 0x206   :  { %180 = vadd.xlane.f32.xlu0 %v179_v63 }
 0x279   :  { %v181_v0 = vpop.xlane.xlu0 %180 }
 0x27a   :  { %280 = vrcp.f32 %v181_v0 }
 0x280   :  { %v281_v1 = vpop.eup %280 }
 0x281   :  { %v185_v2 = vperm.slane %v281_v1, 1  ;;  %v184_v3 = vperm.slane %v281_v1, 0 }
 0x283   :  { %v189_v4 = vmul.f32 %v279_v57, %v185_v2  ;;  %v188_v5 = vmul.f32 %v277_v56, %v184_v3 }
 0x285   :  { %197 = vperm.xlu0 %271, %v189_v4   ;;  %192 = vperm.xlu2 %270, %v188_v5  }
 0x2df   :  { %v193_v6 = vpop.permute.xlu2 %192 }
 0x2e0   :  { %v200_v7 = vmul.f32 %v193_v6, %v425_v11  ;;  %v222_v14 = vperm.slane %v193_v6, %v146_v41 }
 0x2e2   :  { %v202_v8 = vsel %vm45_vm0, %v200_v7, 0.0 }
 0x2e3   :  { %v203_v9 = vrot.slane %v202_v8, 4 }
 0x2e5   :  { %v204_v12 = vadd.f32 %v203_v9, %v202_v8 }
 0x2e7   :  { %v205_v17 = vrot.slane %v204_v12, 2 }
 0x2e9   :  { %v206_v20 = vadd.f32 %v205_v17, %v204_v12 }
 0x2eb   :  { %v207_v23 = vrot.slane %v206_v20, 1 }
 0x2f7   :  { %v198_v13 = vpop.permute.xlu0 %197 }
 0x2f8   :  { %v201_v15 = vmul.f32 %v198_v13, %v420_v10  ;;  %v223_v16 = vperm.slane %v198_v13, %v146_v41  ;;  %v208_v10 = vadd.f32 %v207_v23, %v206_v20 }
 0x2fa   :  { %v209_v11 = vsel %vm45_vm0, %v201_v15, 0.0  ;;  %v224_v18 = vsel %vm149_vm2, %v223_v16, %v222_v14 }
 0x2fb   :  { %v210_v19 = vrot.slane %v209_v11, 4  ;;  %226 = vst.msk [vmem:[#allocation5] sm:$0x3] %vm152_vm3, %v224_v18 }
 0x2fc   :  { %248 = dma.vmem_to_hbm [thread:$0]  %s244_s5, 32, %s246_s21, [#allocation6]  }
 0x2fd   :  { %v211_v21 = vadd.f32 %v210_v19, %v209_v11 }
 0x2ff   :  { %v212_v22 = vrot.slane %v211_v21, 2 }
 0x301   :  { %v213_v24 = vadd.f32 %v212_v22, %v211_v21 }
 0x303   :  { %v214_v25 = vrot.slane %v213_v24, 1 }
 0x305   :  { %v215_v26 = vadd.f32 %v214_v25, %v213_v24 }
 0x307   :  { %v218_v27 = vsel %vm149_vm2, %v215_v26, %v208_v10 }
 0x308   :  { %221 = vst.msk [vmem:[#allocation3] sm:$0x3] %vm220_vm4, %v218_v27 }
 0x309   :  { %237 = dma.vmem_to_hbm [thread:$0]  %s233_s22, 32, %s235_s25, [#allocation4]  }
 0x30a   :  { %330 = dma.done.wait [#allocation4], 32  }
 0x30b   :  { %331 = vsyncadd [#allocation4], 4294967264 }
 0x30c   :  { %332 = dma.done.wait [#allocation6], 32  }
 0x30d   :  { %333 = vsyncadd [#allocation6], 4294967264 }
 0x30e   :  { %257 = vsyncpa [#allocation4], 1 }
 0x30f   :  { %258 = vsyncpa [#allocation6], 1 }

</bundles_post_ra>
